<compile_context>
chip_gen: v7x
topology: tpu7x:2x2x1
jax: 0.10.0
libtpu: 0.0.40
codegen_flags: <defaults>
</compile_context>

<pallas_src>
import numpy as np
import jax
import jax.numpy as jnp
from jax.experimental import pallas as pl
from jax.experimental.pallas import tpu as pltpu

_SUBLANE = 8  # batch-tile granularity


def _round_up(x, m):
    return ((x + m - 1) // m) * m


def _num_tensorcores():
    """Best-effort TensorCores-per-chip: 2 on v7x, 1 on v5e/v6e (safe fallback: 1)."""
    try:
        kind = jax.devices()[0].device_kind.lower()
    except Exception:
        return 1
    return 2 if "v7" in kind else 1


def _orthogonal(shape, key, gain=1.0):
    """Deterministic orthogonal init matching torch.nn.init.orthogonal_ semantics."""
    rows, cols = shape
    flat = jax.random.normal(key, (rows, cols), dtype=jnp.float32)
    if rows < cols:
        flat = flat.T
    q, r = jnp.linalg.qr(flat)
    d = jnp.where(jnp.diag(r) >= 0, 1.0, -1.0)  # copysign-style sign fix
    q = q * d[None, :]
    if rows < cols:
        q = q.T
    return gain * q[:rows, :cols]


# ----------------------------- kernel -----------------------------

def mlp_kernel(x_ref, w1_ref, w2_ref, b_ref, o_ref):
    # Layer 1: (tb, D_in) @ (D_in, H) + b1 -> tanh      bf16 operands, f32 accumulate
    x = x_ref[...].astype(jnp.bfloat16)
    h = jnp.dot(x, w1_ref[...], preferred_element_type=jnp.float32)
    h = jnp.tanh(h + b_ref[0:1, :])
    # Layer 2: (tb, H) @ (H, H) + b2 -> tanh
    y = jnp.dot(h.astype(jnp.bfloat16), w2_ref[...],
                preferred_element_type=jnp.float32)
    o_ref[...] = jnp.tanh(y + b_ref[1:2, :]).astype(o_ref.dtype)


# ----------------------------- wrapper -----------------------------

def prepare_params(W1, b1, W2, b2):
    """One-time parameter prep (hoisted out of the forward).

    W1: (H, D_in) torch layout, W2: (H, H), b1/b2: (H,) or (1, H).
    Returns (w1_t_bf16 (D_in,H), w2_t_bf16 (H,H), b_f32 (2,H)).
    """
    w1_t = jnp.asarray(W1, jnp.float32).T.astype(jnp.bfloat16)
    w2_t = jnp.asarray(W2, jnp.float32).T.astype(jnp.bfloat16)
    b = jnp.stack(
        [jnp.asarray(b1, jnp.float32).reshape(-1),
         jnp.asarray(b2, jnp.float32).reshape(-1)], axis=0)
    return w1_t, w2_t, b


def mlp_base_forward(x, params, *, tile_b=1024):
    """x: (B, D_in) float; params from prepare_params(). Returns (B, H) in x.dtype."""
    w1_t, w2_t, b = params
    B, D_in = x.shape
    H = w1_t.shape[1]

    # Generation-aware batch tile: one step per TensorCore for small B,
    # otherwise clamp to tile_b (multiple of 8). Ragged last tile is masked by Pallas.
    num_tc = _num_tensorcores()
    per_core = _round_up(-(-B // num_tc), _SUBLANE)
    tb = max(_SUBLANE, min(_round_up(tile_b, _SUBLANE), per_core))
    grid = (pl.cdiv(B, tb),)

    cost = pl.CostEstimate(
        flops=2 * B * H * (D_in + H),
        transcendentals=2 * B * H,
        bytes_accessed=(x.size * x.dtype.itemsize        # x read
                        + w1_t.size * 2 + w2_t.size * 2  # bf16 weights (one DMA)
                        + b.size * 4                     # biases
                        + B * H * x.dtype.itemsize),     # output write
    )

    # VMEM guard: only raise the scoped limit if the double-buffered footprint gets
    # large (relevant on v7x's 64 MiB physical / 32 MiB scoped VMEM for huge tile_b).
    est_vmem = (2 * tb * (D_in + H) * 4            # x/out double buffers (f32)
                + 2 * (w1_t.size + w2_t.size)      # resident bf16 weights
                + 4 * b.size + (1 << 20))          # biases + slack
    cp_kwargs = dict(dimension_semantics=("parallel",))  # v7x: shard grid across 2 TCs
    if est_vmem > 24 * (1 << 20):
        cp_kwargs["vmem_limit_bytes"] = min(int(2 * est_vmem), 100 * (1 << 20))

    return pl.pallas_call(
        mlp_kernel,
        out_shape=jax.ShapeDtypeStruct((B, H), x.dtype),
        grid=grid,
        in_specs=[
            pl.BlockSpec((tb, D_in), lambda i: (i, 0)),  # x tile (pipelined)
            pl.BlockSpec((D_in, H), lambda i: (0, 0)),   # W1 resident (constant index)
            pl.BlockSpec((H, H), lambda i: (0, 0)),      # W2 resident
            pl.BlockSpec((2, H), lambda i: (0, 0)),      # packed biases resident
        ],
        out_specs=pl.BlockSpec((tb, H), lambda i: (i, 0)),  # unpadded (B, H) output
        compiler_params=pltpu.CompilerParams(**cp_kwargs),
        cost_estimate=cost,
    )(x, w1_t, w2_t, b)


# ----------------------------- references -----------------------------

def reference_forward_f32(x, w1_t, b1, w2_t, b2):
    """Pure-f32 module semantics."""
    h = jnp.tanh(x @ w1_t + b1)
    return jnp.tanh(h @ w2_t + b2)


def reference_forward_bf16(x, w1_t, b1, w2_t, b2):
    """Same numerics as the kernel: bf16 operands, f32 accumulation."""
    bf = jnp.bfloat16
    h = jnp.tanh(jnp.dot(x.astype(bf), w1_t.astype(bf),
                         preferred_element_type=jnp.float32) + b1)
    return jnp.tanh(jnp.dot(h.astype(bf), w2_t.astype(bf),
                            preferred_element_type=jnp.float32) + b2)


# ----------------------------- test -----------------------------

if __name__ == "__main__":
    key = jax.random.PRNGKey(0)
    k_x, k_w1, k_w2 = jax.random.split(key, 3)

    batch = 300          # deliberately not a tile multiple: exercises the ragged tile
    input_dim = 32
    hidden_size = 64

    # Parameters: orthogonal weights (gain=1), zero biases — as in orthogonal_init().
    W1 = _orthogonal((hidden_size, input_dim), k_w1)    # torch Linear weight (out, in)
    W2 = _orthogonal((hidden_size, hidden_size), k_w2)
    b1 = jnp.zeros((hidden_size,), dtype=jnp.float32)
    b2 = jnp.zeros((hidden_size,), dtype=jnp.float32)

    x = jax.random.normal(k_x, (batch, input_dim), dtype=jnp.float32)

    params = prepare_params(W1, b1, W2, b2)             # one-time prep (hoisted)
    out = mlp_base_forward(x, params, tile_b=1024)
    out = jax.block_until_ready(out)
    assert out.shape == (batch, hidden_size)

    # Tight check vs. a reference with the kernel's declared numerics
    # (bf16 operands, f32 accumulate).
    ref_bf16 = reference_forward_bf16(x, W1.T, b1, W2.T, b2)
    np.testing.assert_allclose(np.asarray(out), np.asarray(ref_bf16),
                               rtol=1e-3, atol=1e-3)

    # Sanity check vs. the pure-f32 module semantics (difference is only bf16
    # operand rounding at K=32/64, ~1e-2 worst case on tanh-bounded outputs).
    ref_f32 = reference_forward_f32(x, W1.T, b1, W2.T, b2)
    np.testing.assert_allclose(np.asarray(out), np.asarray(ref_f32),
                               rtol=0, atol=3e-2)

    print("KERNEL_OK")
</pallas_src>

<mosaic_0001>
module attributes {stable_mosaic.version = 11 : i64} {
  func.func @mlp_kernel(%arg0: i32, %arg1: memref<304x32xf32, #tpu.memory_space<vmem>>, %arg2: memref<32x64xbf16, #tpu.memory_space<vmem>>, %arg3: memref<64x64xbf16, #tpu.memory_space<vmem>>, %arg4: memref<2x64xf32, #tpu.memory_space<vmem>>, %arg5: memref<304x64xf32, #tpu.memory_space<vmem>>) attributes {dimension_semantics = [#tpu.dimension_semantics<parallel>], iteration_bounds = array<i64: 1>, scalar_prefetch = 0 : i64, scratch_operands = 0 : i64, tpu.core_type = #tpu.core_type<tc>, window_params = [{transform_indices = @transform_0, window_bounds = array<i64: 304, 32>}, {pipeline_mode = #tpu.pipeline_mode<synchronous>, transform_indices = @transform_1, window_bounds = array<i64: 32, 64>}, {pipeline_mode = #tpu.pipeline_mode<synchronous>, transform_indices = @transform_2, window_bounds = array<i64: 64, 64>}, {pipeline_mode = #tpu.pipeline_mode<synchronous>, transform_indices = @transform_3, window_bounds = array<i64: 2, 64>}, {transform_indices = @transform_4, window_bounds = array<i64: 304, 64>}]} {
    %c0 = arith.constant 0 : index
    %c0_0 = arith.constant 0 : index
    %0 = vector.load %arg1[%c0, %c0_0] : memref<304x32xf32, #tpu.memory_space<vmem>>, vector<304x32xf32>
    %1 = arith.truncf %0 : vector<304x32xf32> to vector<304x32xbf16>
    %c0_1 = arith.constant 0 : index
    %c0_2 = arith.constant 0 : index
    %2 = vector.load %arg2[%c0_1, %c0_2] : memref<32x64xbf16, #tpu.memory_space<vmem>>, vector<32x64xbf16>
    %cst = arith.constant dense<0.000000e+00> : vector<304x64xf32>
    %3 = tpu.matmul %1, %2, %cst {dimension_numbers = #tpu.dot_dimension_numbers<[1], [0], [0], [1], [0, 0, 1, 1], [], []>} : vector<304x32xbf16>, vector<32x64xbf16>, vector<304x64xf32> -> vector<304x64xf32>
    %c0_3 = arith.constant 0 : index
    %c0_4 = arith.constant 0 : index
    %4 = vector.load %arg4[%c0_3, %c0_4] : memref<2x64xf32, #tpu.memory_space<vmem>>, vector<1x64xf32>
    %5 = vector.broadcast %4 : vector<1x64xf32> to vector<304x64xf32>
    %6 = arith.addf %3, %5 : vector<304x64xf32>
    %7 = math.tanh %6 : vector<304x64xf32>
    %8 = arith.truncf %7 : vector<304x64xf32> to vector<304x64xbf16>
    %c0_5 = arith.constant 0 : index
    %c0_6 = arith.constant 0 : index
    %9 = vector.load %arg3[%c0_5, %c0_6] : memref<64x64xbf16, #tpu.memory_space<vmem>>, vector<64x64xbf16>
    %cst_7 = arith.constant dense<0.000000e+00> : vector<304x64xf32>
    %10 = tpu.matmul %8, %9, %cst_7 {dimension_numbers = #tpu.dot_dimension_numbers<[1], [0], [0], [1], [0, 0, 1, 1], [], []>} : vector<304x64xbf16>, vector<64x64xbf16>, vector<304x64xf32> -> vector<304x64xf32>
    %c1 = arith.constant 1 : index
    %c0_8 = arith.constant 0 : index
    %11 = vector.load %arg4[%c1, %c0_8] : memref<2x64xf32, #tpu.memory_space<vmem>>, vector<1x64xf32>
    %12 = vector.broadcast %11 : vector<1x64xf32> to vector<304x64xf32>
    %13 = arith.addf %10, %12 : vector<304x64xf32>
    %14 = math.tanh %13 : vector<304x64xf32>
    %c0_9 = arith.constant 0 : index
    %c0_10 = arith.constant 0 : index
    %15 = vector.load %arg5[%c0_9, %c0_10] : memref<304x64xf32, #tpu.memory_space<vmem>>, vector<304x64xf32>
    tpu.vector_store %arg5[%c0_9, %c0_10], %14 {strides = array<i32>} : memref<304x64xf32, #tpu.memory_space<vmem>>, vector<304x64xf32>,
    return
  }
  func.func @transform_0(%arg0: i32) -> (i32, i32) {
    %c0_i32 = arith.constant 0 : i32
    %c0_i32_0 = arith.constant 0 : i32
    return %arg0, %c0_i32 : i32, i32
  }
  func.func @transform_1(%arg0: i32) -> (i32, i32) {
    %c0_i32 = arith.constant 0 : i32
    %c0_i32_0 = arith.constant 0 : i32
    %c0_i32_1 = arith.constant 0 : i32
    return %c0_i32, %c0_i32_0 : i32, i32
  }
  func.func @transform_2(%arg0: i32) -> (i32, i32) {
    %c0_i32 = arith.constant 0 : i32
    %c0_i32_0 = arith.constant 0 : i32
    %c0_i32_1 = arith.constant 0 : i32
    return %c0_i32, %c0_i32_0 : i32, i32
  }
  func.func @transform_3(%arg0: i32) -> (i32, i32) {
    %c0_i32 = arith.constant 0 : i32
    %c0_i32_0 = arith.constant 0 : i32
    %c0_i32_1 = arith.constant 0 : i32
    return %c0_i32, %c0_i32_0 : i32, i32
  }
  func.func @transform_4(%arg0: i32) -> (i32, i32) {
    %c0_i32 = arith.constant 0 : i32
    %c0_i32_0 = arith.constant 0 : i32
    return %arg0, %c0_i32 : i32, i32
  }
}

</mosaic_0001>

<bundles_post_ra>
// kernel: tpu_custom_call.1
= control target key start
LH: loop header
LB: loop body
LE: loop exit
PB: predicated region body
PF: predicated region fallthrough
CT: control target
= control target key end

     0   :  { %v1170_v0 = vmov 0.0   ;;  %vm1171_vm0 = vmmov 0   ;;  %vm96_vm1 = vcmask 261120   ;;  %vm433_vm2 = vcmask 523264   ;;  %s1687_s1 = inlined_call_operand.vmem [shape: bf16[32,64], index: 1, kind: input, shape index: {}]   ;;  %s1688_s0 = inlined_call_operand.vmem [shape: f32[300,32], index: 0, kind: input, shape index: {}]   ;;  %s1689_s2 = inlined_call_operand.vmem [shape: bf16[64,64], index: 2, kind: input, shape index: {}]   ;;  %s1690_s3 = inlined_call_operand.vmem [shape: f32[2,64], index: 3, kind: input, shape index: {}]   ;;  %s1691_s4 = inlined_call_operand.vmem [shape: f32[300,64], index: 4, kind: output, shape index: {}]  }
   0x1   :  { %846 = vmatprep.subr.bf16.mxu0 %v1170_v0  ;;  %v1012_v1 = vld [vmem:[%s1687_s1] sm:$0xff]   ;;  %850 = vmatprep.mubr.msk.bf16.mxu0 %vm1171_vm0, %v1170_v0  ;;  %v1013_v2 = vld [vmem:[%s1687_s1 + $0x8] sm:$0xff]   ;;  %v20_v6 = vld [vmem:[%s1688_s0 + $0x10] sm:$0xff] }
   0x2   :  { %926 = vmatprep.subr.bf16.mxu1 %v1170_v0  ;;  %934 = vmatprep.mubr.msk.bf16.mxu1 %vm1171_vm0, %v1170_v0  ;;  %v18_v3 = vld [vmem:[%s1688_s0] sm:$0xff]  ;;  %v19_v4 = vld [vmem:[%s1688_s0 + $0x8] sm:$0xff]  ;;  %v21_v7 = vld [vmem:[%s1688_s0 + $0x18] sm:$0xff] }
   0x3   :  { %847 = vmatpush3.bf16.msra.mxu0 %v1012_v1  ;;  %v56_v5 = vpack.c.bf16 %v19_v4, %v18_v3  ;;  %v57_v8 = vpack.c.bf16 %v21_v7, %v20_v6  ;;  %v22_v9 = vld [vmem:[%s1688_s0 + $0x20] sm:$0xff]  ;;  %v23_v10 = vld [vmem:[%s1688_s0 + $0x28] sm:$0xff]  ;;  %v24_v12 = vld [vmem:[%s1688_s0 + $0x30] sm:$0xff] }
   0x4   :  { %848 = vmatprep.subr.bf16.mxu0 %v1170_v0  ;;  %v58_v11 = vpack.c.bf16 %v23_v10, %v22_v9  ;;  %v25_v13 = vld [vmem:[%s1688_s0 + $0x38] sm:$0xff]  ;;  %v26_v15 = vld [vmem:[%s1688_s0 + $0x40] sm:$0xff]  ;;  %v27_v16 = vld [vmem:[%s1688_s0 + $0x48] sm:$0xff] }
   0x5   :  { %v59_v14 = vpack.c.bf16 %v25_v13, %v24_v12  ;;  %v60_v17 = vpack.c.bf16 %v27_v16, %v26_v15  ;;  %v28_v18 = vld [vmem:[%s1688_s0 + $0x50] sm:$0xff]  ;;  %v29_v19 = vld [vmem:[%s1688_s0 + $0x58] sm:$0xff]  ;;  %v30_v21 = vld [vmem:[%s1688_s0 + $0x60] sm:$0xff] }
   0x6   :  { %v61_v20 = vpack.c.bf16 %v29_v19, %v28_v18  ;;  %v31_v22 = vld [vmem:[%s1688_s0 + $0x68] sm:$0xff]  ;;  %v32_v24 = vld [vmem:[%s1688_s0 + $0x70] sm:$0xff]  ;;  %v33_v25 = vld [vmem:[%s1688_s0 + $0x78] sm:$0xff] }
   0x7   :  { %849 = vmatpush3.bf16.msra.mxu0 %v1013_v2  ;;  %v62_v23 = vpack.c.bf16 %v31_v22, %v30_v21  ;;  %v63_v26 = vpack.c.bf16 %v33_v25, %v32_v24  ;;  %v34_v27 = vld [vmem:[%s1688_s0 + $0x80] sm:$0xff]  ;;  %v35_v28 = vld [vmem:[%s1688_s0 + $0x88] sm:$0xff]  ;;  %v36_v30 = vld [vmem:[%s1688_s0 + $0x90] sm:$0xff] }
   0x8   :  { %v64_v29 = vpack.c.bf16 %v35_v28, %v34_v27  ;;  %v37_v31 = vld [vmem:[%s1688_s0 + $0x98] sm:$0xff]  ;;  %v38_v33 = vld [vmem:[%s1688_s0 + $0xa0] sm:$0xff]  ;;  %v39_v34 = vld [vmem:[%s1688_s0 + $0xa8] sm:$0xff] }
   0x9   :  { %v65_v32 = vpack.c.bf16 %v37_v31, %v36_v30  ;;  %v66_v35 = vpack.c.bf16 %v39_v34, %v38_v33  ;;  %v40_v36 = vld [vmem:[%s1688_s0 + $0xb0] sm:$0xff]  ;;  %v41_v37 = vld [vmem:[%s1688_s0 + $0xb8] sm:$0xff]  ;;  %v1014_v39 = vld [vmem:[%s1689_s2] sm:$0xff]  }
   0xa   :  { %851 = vmatmul.mubr.msk.bf16.vlgmr.msra.gmra.mrb[0].mxu0 %vm96_vm1, %v56_v5  ;;  %v67_v38 = vpack.c.bf16 %v41_v37, %v40_v36  ;;  %927 = vmatpush3.bf16.msra.mxu1 %v1014_v39  ;;  %v1015_v40 = vld [vmem:[%s1689_s2 + $0x8] sm:$0xff]   ;;  %v42_v41 = vld [vmem:[%s1688_s0 + $0xc0] sm:$0xff]  ;;  %v1016_v44 = vld [vmem:[%s1689_s2 + $0x10] sm:$0xff]  }
   0xb   :  { %854 = vmatprep.mubr.msk.bf16.mxu0 %vm1171_vm0, %v1170_v0  ;;  %928 = vmatprep.subr.bf16.mxu1 %v1170_v0  ;;  %v43_v42 = vld [vmem:[%s1688_s0 + $0xc8] sm:$0xff]  ;;  %v1017_v45 = vld [vmem:[%s1689_s2 + $0x18] sm:$0xff]   ;;  %v44_v46 = vld [vmem:[%s1688_s0 + $0xd0] sm:$0xff] }
   0xc   :  { %v68_v43 = vpack.c.bf16 %v43_v42, %v42_v41  ;;  %v45_v47 = vld [vmem:[%s1688_s0 + $0xd8] sm:$0xff]  ;;  %v46_v49 = vld [vmem:[%s1688_s0 + $0xe0] sm:$0xff]  ;;  %v47_v50 = vld [vmem:[%s1688_s0 + $0xe8] sm:$0xff] }
   0xd   :  { %v69_v48 = vpack.c.bf16 %v45_v47, %v44_v46  ;;  %v70_v51 = vpack.c.bf16 %v47_v50, %v46_v49  ;;  %v48_v52 = vld [vmem:[%s1688_s0 + $0xf0] sm:$0xff]  ;;  %v49_v53 = vld [vmem:[%s1688_s0 + $0xf8] sm:$0xff]  ;;  %v50_v55 = vld [vmem:[%s1688_s0 + $0x100] sm:$0xff] }
   0xe   :  { %929 = vmatpush3.bf16.msra.mxu1 %v1015_v40  ;;  %v71_v54 = vpack.c.bf16 %v49_v53, %v48_v52  ;;  %v51_v56 = vld [vmem:[%s1688_s0 + $0x108] sm:$0xff]  ;;  %v52_v58 = vld [vmem:[%s1688_s0 + $0x110] sm:$0xff]  ;;  %v53_v59 = vld [vmem:[%s1688_s0 + $0x118] sm:$0xff] }
   0xf   :  { %930 = vmatprep.subr.bf16.mxu1 %v1170_v0  ;;  %v72_v57 = vpack.c.bf16 %v51_v56, %v50_v55  ;;  %v73_v60 = vpack.c.bf16 %v53_v59, %v52_v58  ;;  %v54_v61 = vld [vmem:[%s1688_s0 + $0x120] sm:$0xff]  ;;  %v55_v62 = vld [vmem:[%s1688_s0 + $0x128] sm:$0xff] }
  0x10   :  { %v74_v63 = vpack.c.bf16 %v55_v62, %v54_v61  ;;  %v1397_v1 = vld [vmem:[%s1690_s3] ss:$0 sm:$0xff] }
  0x12   :  { %855 = vmatmul.mubr.msk.bf16.gmra.mrb[4].mxu0 %vm96_vm1, %v57_v8  ;;  %931 = vmatpush3.bf16.msra.mxu1 %v1016_v44 }
  0x13   :  { %858 = vmatprep.mubr.msk.bf16.mxu0 %vm1171_vm0, %v1170_v0  ;;  %932 = vmatprep.subr.bf16.mxu1 %v1170_v0 }
  0x16   :  { %933 = vmatpush3.bf16.msra.mxu1 %v1017_v45 }
  0x1a   :  { %859 = vmatmul.mubr.msk.bf16.gmra.mrb[8].mxu0 %vm96_vm1, %v58_v11 }
  0x1b   :  { %862 = vmatprep.mubr.msk.bf16.mxu0 %vm1171_vm0, %v1170_v0 }
  0x22   :  { %863 = vmatmul.mubr.msk.bf16.gmra.mrb[12].mxu0 %vm96_vm1, %v59_v14 }
  0x23   :  { %866 = vmatprep.mubr.msk.bf16.mxu0 %vm1171_vm0, %v1170_v0 }
  0x2a   :  { %867 = vmatmul.mubr.msk.bf16.gmra.mrb[16].mxu0 %vm96_vm1, %v60_v17 }
  0x2b   :  { %870 = vmatprep.mubr.msk.bf16.mxu0 %vm1171_vm0, %v1170_v0 }
  0x32   :  { %871 = vmatmul.mubr.msk.bf16.gmra.mrb[20].mxu0 %vm96_vm1, %v61_v20 }
  0x33   :  { %874 = vmatprep.mubr.msk.bf16.mxu0 %vm1171_vm0, %v1170_v0 }
  0x3a   :  { %875 = vmatmul.mubr.msk.bf16.gmra.mrb[24].mxu0 %vm96_vm1, %v62_v23 }
  0x3b   :  { %878 = vmatprep.mubr.msk.bf16.mxu0 %vm1171_vm0, %v1170_v0 }
  0x42   :  { %879 = vmatmul.mubr.msk.bf16.gmra.mrb[28].mxu0 %vm96_vm1, %v63_v26 }
  0x43   :  { %882 = vmatprep.mubr.msk.bf16.mxu0 %vm1171_vm0, %v1170_v0 }
  0x4a   :  { %883 = vmatmul.mubr.msk.bf16.gmra.mrb[32].mxu0 %vm96_vm1, %v64_v29 }
  0x4b   :  { %886 = vmatprep.mubr.msk.bf16.mxu0 %vm1171_vm0, %v1170_v0 }
  0x52   :  { %887 = vmatmul.mubr.msk.bf16.gmra.mrb[36].mxu0 %vm96_vm1, %v65_v32 }
  0x53   :  { %890 = vmatprep.mubr.msk.bf16.mxu0 %vm1171_vm0, %v1170_v0 }
  0x5a   :  { %891 = vmatmul.mubr.msk.bf16.gmra.mrb[40].mxu0 %vm96_vm1, %v66_v35 }
  0x5b   :  { %894 = vmatprep.mubr.msk.bf16.mxu0 %vm1171_vm0, %v1170_v0 }
  0x62   :  { %895 = vmatmul.mubr.msk.bf16.gmra.mrb[44].mxu0 %vm96_vm1, %v67_v38 }
  0x63   :  { %898 = vmatprep.mubr.msk.bf16.mxu0 %vm1171_vm0, %v1170_v0 }
  0x6a   :  { %899 = vmatmul.mubr.msk.bf16.gmra.mrb[48].mxu0 %vm96_vm1, %v68_v43 }
  0x6b   :  { %902 = vmatprep.mubr.msk.bf16.mxu0 %vm1171_vm0, %v1170_v0 }
  0x72   :  { %903 = vmatmul.mubr.msk.bf16.gmra.mrb[52].mxu0 %vm96_vm1, %v69_v48 }
  0x73   :  { %906 = vmatprep.mubr.msk.bf16.mxu0 %vm1171_vm0, %v1170_v0 }
  0x7a   :  { %907 = vmatmul.mubr.msk.bf16.gmra.mrb[56].mxu0 %vm96_vm1, %v70_v51 }
  0x7b   :  { %910 = vmatprep.mubr.msk.bf16.mxu0 %vm1171_vm0, %v1170_v0 }
  0x82   :  { %911 = vmatmul.mubr.msk.bf16.gmra.mrb[60].mxu0 %vm96_vm1, %v71_v54 }
  0x83   :  { %914 = vmatprep.mubr.msk.bf16.mxu0 %vm1171_vm0, %v1170_v0 }
  0x8a   :  { %915 = vmatmul.mubr.msk.bf16.gmra.mrb[64].mxu0 %vm96_vm1, %v72_v57 }
  0x8b   :  { %918 = vmatprep.mubr.msk.bf16.mxu0 %vm1171_vm0, %v1170_v0 }
  0x92   :  { %919 = vmatmul.mubr.msk.bf16.gmra.mrb[68].mxu0 %vm96_vm1, %v73_v60 }
  0x93   :  { %922 = vmatprep.mubr.msk.bf16.mxu0 %vm1171_vm0, %v1170_v0 }
  0x9a   :  { %923 = vmatmul.mubr.msk.bf16.gmra.mrb[72].mxu0 %vm96_vm1, %v74_v63 }
  0xdd   :  { %v188_v2 = vpop.f32.mrb[0].mxu0 }
  0xde   :  { %v189_v3 = vadd.f32 %v1397_v1, %v188_v2  ;;  %v852_v4 = vpop.f32.mrb[1].mxu0 }
  0xdf   :  { %v191_v5 = vpop.f32.mrb[2].mxu0 }
  0xe0   :  { %v192_v6 = vadd.f32 %v1397_v1, %v191_v5  ;;  %v853_v7 = vpop.f32.mrb[3].mxu0  ;;  %1018 = vtanh.f32 %v189_v3 }
  0xe2   :  { %1020 = vtanh.f32 %v192_v6 }
  0xe5   :  { %v196_v8 = vpop.f32.mrb[4].mxu0 }
  0xe6   :  { %v197_v9 = vadd.f32 %v1397_v1, %v196_v8  ;;  %v856_v10 = vpop.f32.mrb[5].mxu0 }
  0xe7   :  { %v199_v11 = vpop.f32.mrb[6].mxu0 }
  0xe8   :  { %v200_v12 = vadd.f32 %v1397_v1, %v199_v11  ;;  %v857_v13 = vpop.f32.mrb[7].mxu0  ;;  %1022 = vtanh.f32 %v197_v9 }
  0xea   :  { %1024 = vtanh.f32 %v200_v12  ;;  %v1019_v14 = vpop.eup %1018 }
  0xec   :  { %v1021_v15 = vpop.eup %1020 }
  0xed   :  { %v204_v16 = vpop.f32.mrb[8].mxu0  ;;  %v377_v17 = vpack.c.bf16 %v1021_v15, %v1019_v14 }
  0xee   :  { %v205_v18 = vadd.f32 %v1397_v1, %v204_v16  ;;  %v860_v19 = vpop.f32.mrb[9].mxu0 }
  0xef   :  { %v207_v20 = vpop.f32.mrb[10].mxu0  ;;  %935 = vmatmul.mubr.msk.bf16.vlgmr.msra.gmra.mrb[0].mxu1 %vm433_vm2, %v377_v17 }
  0xf0   :  { %v208_v21 = vadd.f32 %v1397_v1, %v207_v20  ;;  %v861_v22 = vpop.f32.mrb[11].mxu0  ;;  %938 = vmatprep.mubr.msk.bf16.mxu1 %vm1171_vm0, %v1170_v0  ;;  %1026 = vtanh.f32 %v205_v18 }
  0xf2   :  { %1028 = vtanh.f32 %v208_v21  ;;  %v1023_v23 = vpop.eup %1022 }
  0xf4   :  { %v1025_v24 = vpop.eup %1024 }
  0xf5   :  { %v212_v25 = vpop.f32.mrb[12].mxu0  ;;  %v378_v26 = vpack.c.bf16 %v1025_v24, %v1023_v23 }
  0xf6   :  { %v213_v27 = vadd.f32 %v1397_v1, %v212_v25  ;;  %v864_v28 = vpop.f32.mrb[13].mxu0 }
  0xf7   :  { %v215_v29 = vpop.f32.mrb[14].mxu0  ;;  %939 = vmatmul.mubr.msk.bf16.gmra.mrb[4].mxu1 %vm433_vm2, %v378_v26 }
  0xf8   :  { %v216_v30 = vadd.f32 %v1397_v1, %v215_v29  ;;  %v865_v31 = vpop.f32.mrb[15].mxu0  ;;  %942 = vmatprep.mubr.msk.bf16.mxu1 %vm1171_vm0, %v1170_v0  ;;  %1030 = vtanh.f32 %v213_v27 }
  0xfa   :  { %1032 = vtanh.f32 %v216_v30  ;;  %v1027_v32 = vpop.eup %1026 }
  0xfc   :  { %v1029_v33 = vpop.eup %1028 }
  0xfd   :  { %v220_v34 = vpop.f32.mrb[16].mxu0  ;;  %v379_v35 = vpack.c.bf16 %v1029_v33, %v1027_v32 }
  0xfe   :  { %v221_v36 = vadd.f32 %v1397_v1, %v220_v34  ;;  %v868_v37 = vpop.f32.mrb[17].mxu0 }
  0xff   :  { %v223_v38 = vpop.f32.mrb[18].mxu0  ;;  %943 = vmatmul.mubr.msk.bf16.gmra.mrb[8].mxu1 %vm433_vm2, %v379_v35 }
 0x100   :  { %v224_v39 = vadd.f32 %v1397_v1, %v223_v38  ;;  %v869_v40 = vpop.f32.mrb[19].mxu0  ;;  %946 = vmatprep.mubr.msk.bf16.mxu1 %vm1171_vm0, %v1170_v0  ;;  %1034 = vtanh.f32 %v221_v36 }
 0x102   :  { %1036 = vtanh.f32 %v224_v39  ;;  %v1031_v41 = vpop.eup %1030 }
 0x104   :  { %v1033_v42 = vpop.eup %1032 }
 0x105   :  { %v228_v43 = vpop.f32.mrb[20].mxu0  ;;  %v380_v44 = vpack.c.bf16 %v1033_v42, %v1031_v41 }
 0x106   :  { %v229_v45 = vadd.f32 %v1397_v1, %v228_v43  ;;  %v872_v46 = vpop.f32.mrb[21].mxu0 }
 0x107   :  { %v231_v47 = vpop.f32.mrb[22].mxu0  ;;  %947 = vmatmul.mubr.msk.bf16.gmra.mrb[12].mxu1 %vm433_vm2, %v380_v44 }
 0x108   :  { %v232_v48 = vadd.f32 %v1397_v1, %v231_v47  ;;  %v873_v49 = vpop.f32.mrb[23].mxu0  ;;  %950 = vmatprep.mubr.msk.bf16.mxu1 %vm1171_vm0, %v1170_v0  ;;  %1038 = vtanh.f32 %v229_v45 }
 0x10a   :  { %1040 = vtanh.f32 %v232_v48  ;;  %v1035_v50 = vpop.eup %1034 }
 0x10c   :  { %v1037_v51 = vpop.eup %1036 }
 0x10d   :  { %v236_v52 = vpop.f32.mrb[24].mxu0  ;;  %v381_v53 = vpack.c.bf16 %v1037_v51, %v1035_v50 }
 0x10e   :  { %v237_v54 = vadd.f32 %v1397_v1, %v236_v52  ;;  %v876_v55 = vpop.f32.mrb[25].mxu0 }
 0x10f   :  { %v239_v56 = vpop.f32.mrb[26].mxu0  ;;  %951 = vmatmul.mubr.msk.bf16.gmra.mrb[16].mxu1 %vm433_vm2, %v381_v53 }
 0x110   :  { %v240_v57 = vadd.f32 %v1397_v1, %v239_v56  ;;  %v877_v58 = vpop.f32.mrb[27].mxu0  ;;  %954 = vmatprep.mubr.msk.bf16.mxu1 %vm1171_vm0, %v1170_v0  ;;  %1042 = vtanh.f32 %v237_v54 }
 0x112   :  { %1044 = vtanh.f32 %v240_v57  ;;  %v1039_v59 = vpop.eup %1038 }
 0x114   :  { %v1041_v60 = vpop.eup %1040 }
 0x115   :  { %v244_v61 = vpop.f32.mrb[28].mxu0  ;;  %v382_v62 = vpack.c.bf16 %v1041_v60, %v1039_v59 }
 0x116   :  { %v245_v63 = vadd.f32 %v1397_v1, %v244_v61  ;;  %v880_v2 = vpop.f32.mrb[29].mxu0 }
 0x117   :  { %v247_v3 = vpop.f32.mrb[30].mxu0  ;;  %955 = vmatmul.mubr.msk.bf16.gmra.mrb[20].mxu1 %vm433_vm2, %v382_v62 }
 0x118   :  { %v248_v4 = vadd.f32 %v1397_v1, %v247_v3  ;;  %v881_v5 = vpop.f32.mrb[31].mxu0  ;;  %958 = vmatprep.mubr.msk.bf16.mxu1 %vm1171_vm0, %v1170_v0  ;;  %1046 = vtanh.f32 %v245_v63 }
 0x11a   :  { %1048 = vtanh.f32 %v248_v4  ;;  %v1043_v6 = vpop.eup %1042 }
 0x11c   :  { %v1045_v7 = vpop.eup %1044 }
 0x11d   :  { %v252_v8 = vpop.f32.mrb[32].mxu0  ;;  %v383_v9 = vpack.c.bf16 %v1045_v7, %v1043_v6 }
 0x11e   :  { %v253_v10 = vadd.f32 %v1397_v1, %v252_v8  ;;  %v884_v11 = vpop.f32.mrb[33].mxu0 }
 0x11f   :  { %v255_v12 = vpop.f32.mrb[34].mxu0  ;;  %959 = vmatmul.mubr.msk.bf16.gmra.mrb[24].mxu1 %vm433_vm2, %v383_v9 }
 0x120   :  { %v256_v13 = vadd.f32 %v1397_v1, %v255_v12  ;;  %v885_v14 = vpop.f32.mrb[35].mxu0  ;;  %962 = vmatprep.mubr.msk.bf16.mxu1 %vm1171_vm0, %v1170_v0  ;;  %1050 = vtanh.f32 %v253_v10 }
 0x122   :  { %1052 = vtanh.f32 %v256_v13  ;;  %v1047_v15 = vpop.eup %1046 }
 0x124   :  { %v1049_v16 = vpop.eup %1048 }
 0x125   :  { %v260_v17 = vpop.f32.mrb[36].mxu0  ;;  %v384_v18 = vpack.c.bf16 %v1049_v16, %v1047_v15 }
 0x126   :  { %v261_v19 = vadd.f32 %v1397_v1, %v260_v17  ;;  %v888_v20 = vpop.f32.mrb[37].mxu0 }
 0x127   :  { %v263_v21 = vpop.f32.mrb[38].mxu0  ;;  %963 = vmatmul.mubr.msk.bf16.gmra.mrb[28].mxu1 %vm433_vm2, %v384_v18 }
 0x128   :  { %v264_v22 = vadd.f32 %v1397_v1, %v263_v21  ;;  %v889_v23 = vpop.f32.mrb[39].mxu0  ;;  %966 = vmatprep.mubr.msk.bf16.mxu1 %vm1171_vm0, %v1170_v0  ;;  %1054 = vtanh.f32 %v261_v19 }
 0x12a   :  { %1056 = vtanh.f32 %v264_v22  ;;  %v1051_v24 = vpop.eup %1050 }
 0x12c   :  { %v1053_v25 = vpop.eup %1052 }
 0x12d   :  { %v268_v26 = vpop.f32.mrb[40].mxu0  ;;  %v385_v27 = vpack.c.bf16 %v1053_v25, %v1051_v24 }
 0x12e   :  { %v269_v28 = vadd.f32 %v1397_v1, %v268_v26  ;;  %v892_v29 = vpop.f32.mrb[41].mxu0 }
 0x12f   :  { %v271_v30 = vpop.f32.mrb[42].mxu0  ;;  %967 = vmatmul.mubr.msk.bf16.gmra.mrb[32].mxu1 %vm433_vm2, %v385_v27 }
 0x130   :  { %v272_v31 = vadd.f32 %v1397_v1, %v271_v30  ;;  %v893_v32 = vpop.f32.mrb[43].mxu0  ;;  %970 = vmatprep.mubr.msk.bf16.mxu1 %vm1171_vm0, %v1170_v0  ;;  %1058 = vtanh.f32 %v269_v28 }
 0x132   :  { %1060 = vtanh.f32 %v272_v31  ;;  %v1055_v33 = vpop.eup %1054 }
 0x134   :  { %v1057_v34 = vpop.eup %1056 }
 0x135   :  { %v276_v35 = vpop.f32.mrb[44].mxu0  ;;  %v386_v36 = vpack.c.bf16 %v1057_v34, %v1055_v33 }
 0x136   :  { %v277_v37 = vadd.f32 %v1397_v1, %v276_v35  ;;  %v896_v38 = vpop.f32.mrb[45].mxu0 }
 0x137   :  { %v279_v39 = vpop.f32.mrb[46].mxu0  ;;  %971 = vmatmul.mubr.msk.bf16.gmra.mrb[36].mxu1 %vm433_vm2, %v386_v36 }
 0x138   :  { %v280_v40 = vadd.f32 %v1397_v1, %v279_v39  ;;  %v897_v41 = vpop.f32.mrb[47].mxu0  ;;  %974 = vmatprep.mubr.msk.bf16.mxu1 %vm1171_vm0, %v1170_v0  ;;  %1062 = vtanh.f32 %v277_v37 }
 0x13a   :  { %1064 = vtanh.f32 %v280_v40  ;;  %v1059_v42 = vpop.eup %1058 }
 0x13c   :  { %v1061_v43 = vpop.eup %1060 }
 0x13d   :  { %v284_v44 = vpop.f32.mrb[48].mxu0  ;;  %v387_v45 = vpack.c.bf16 %v1061_v43, %v1059_v42 }
 0x13e   :  { %v285_v46 = vadd.f32 %v1397_v1, %v284_v44  ;;  %v900_v47 = vpop.f32.mrb[49].mxu0 }
 0x13f   :  { %v287_v48 = vpop.f32.mrb[50].mxu0  ;;  %975 = vmatmul.mubr.msk.bf16.gmra.mrb[40].mxu1 %vm433_vm2, %v387_v45 }
 0x140   :  { %v288_v49 = vadd.f32 %v1397_v1, %v287_v48  ;;  %v901_v50 = vpop.f32.mrb[51].mxu0  ;;  %978 = vmatprep.mubr.msk.bf16.mxu1 %vm1171_vm0, %v1170_v0  ;;  %1066 = vtanh.f32 %v285_v46 }
 0x142   :  { %1068 = vtanh.f32 %v288_v49  ;;  %v1063_v51 = vpop.eup %1062 }
 0x144   :  { %v1065_v52 = vpop.eup %1064 }
 0x145   :  { %v292_v53 = vpop.f32.mrb[52].mxu0  ;;  %v388_v54 = vpack.c.bf16 %v1065_v52, %v1063_v51 }
 0x146   :  { %v293_v55 = vadd.f32 %v1397_v1, %v292_v53  ;;  %v904_v56 = vpop.f32.mrb[53].mxu0 }
 0x147   :  { %v295_v57 = vpop.f32.mrb[54].mxu0  ;;  %979 = vmatmul.mubr.msk.bf16.gmra.mrb[44].mxu1 %vm433_vm2, %v388_v54 }
 0x148   :  { %v296_v58 = vadd.f32 %v1397_v1, %v295_v57  ;;  %v905_v59 = vpop.f32.mrb[55].mxu0  ;;  %982 = vmatprep.mubr.msk.bf16.mxu1 %vm1171_vm0, %v1170_v0  ;;  %1070 = vtanh.f32 %v293_v55 }
 0x14a   :  { %1072 = vtanh.f32 %v296_v58  ;;  %v1067_v60 = vpop.eup %1066 }
 0x14c   :  { %v1069_v61 = vpop.eup %1068 }
 0x14d   :  { %v300_v62 = vpop.f32.mrb[56].mxu0  ;;  %v389_v63 = vpack.c.bf16 %v1069_v61, %v1067_v60 }
 0x14e   :  { %v301_v2 = vadd.f32 %v1397_v1, %v300_v62  ;;  %v908_v3 = vpop.f32.mrb[57].mxu0 }
 0x14f   :  { %v303_v4 = vpop.f32.mrb[58].mxu0  ;;  %983 = vmatmul.mubr.msk.bf16.gmra.mrb[48].mxu1 %vm433_vm2, %v389_v63 }
 0x150   :  { %v304_v5 = vadd.f32 %v1397_v1, %v303_v4  ;;  %v909_v6 = vpop.f32.mrb[59].mxu0  ;;  %986 = vmatprep.mubr.msk.bf16.mxu1 %vm1171_vm0, %v1170_v0  ;;  %1074 = vtanh.f32 %v301_v2 }
 0x152   :  { %1076 = vtanh.f32 %v304_v5  ;;  %v1071_v7 = vpop.eup %1070 }
 0x154   :  { %v1073_v8 = vpop.eup %1072 }
 0x155   :  { %v308_v9 = vpop.f32.mrb[60].mxu0  ;;  %v390_v10 = vpack.c.bf16 %v1073_v8, %v1071_v7 }
 0x156   :  { %v309_v11 = vadd.f32 %v1397_v1, %v308_v9  ;;  %v912_v12 = vpop.f32.mrb[61].mxu0 }
 0x157   :  { %v311_v13 = vpop.f32.mrb[62].mxu0  ;;  %987 = vmatmul.mubr.msk.bf16.gmra.mrb[52].mxu1 %vm433_vm2, %v390_v10 }
 0x158   :  { %v312_v14 = vadd.f32 %v1397_v1, %v311_v13  ;;  %v913_v15 = vpop.f32.mrb[63].mxu0  ;;  %990 = vmatprep.mubr.msk.bf16.mxu1 %vm1171_vm0, %v1170_v0  ;;  %1078 = vtanh.f32 %v309_v11 }
 0x15a   :  { %1080 = vtanh.f32 %v312_v14  ;;  %v1075_v16 = vpop.eup %1074 }
 0x15c   :  { %v1077_v17 = vpop.eup %1076 }
 0x15d   :  { %v316_v18 = vpop.f32.mrb[64].mxu0  ;;  %v391_v19 = vpack.c.bf16 %v1077_v17, %v1075_v16 }
 0x15e   :  { %v317_v20 = vadd.f32 %v1397_v1, %v316_v18  ;;  %v916_v21 = vpop.f32.mrb[65].mxu0 }
 0x15f   :  { %v319_v22 = vpop.f32.mrb[66].mxu0  ;;  %991 = vmatmul.mubr.msk.bf16.gmra.mrb[56].mxu1 %vm433_vm2, %v391_v19 }
 0x160   :  { %v320_v23 = vadd.f32 %v1397_v1, %v319_v22  ;;  %v917_v24 = vpop.f32.mrb[67].mxu0  ;;  %994 = vmatprep.mubr.msk.bf16.mxu1 %vm1171_vm0, %v1170_v0  ;;  %1082 = vtanh.f32 %v317_v20 }
 0x162   :  { %1084 = vtanh.f32 %v320_v23  ;;  %v1079_v25 = vpop.eup %1078 }
 0x164   :  { %v1081_v26 = vpop.eup %1080 }
 0x165   :  { %v324_v27 = vpop.f32.mrb[68].mxu0  ;;  %v392_v28 = vpack.c.bf16 %v1081_v26, %v1079_v25 }
 0x166   :  { %v325_v29 = vadd.f32 %v1397_v1, %v324_v27  ;;  %v920_v30 = vpop.f32.mrb[69].mxu0 }
 0x167   :  { %v327_v31 = vpop.f32.mrb[70].mxu0  ;;  %995 = vmatmul.mubr.msk.bf16.gmra.mrb[60].mxu1 %vm433_vm2, %v392_v28 }
 0x168   :  { %v328_v32 = vadd.f32 %v1397_v1, %v327_v31  ;;  %v921_v33 = vpop.f32.mrb[71].mxu0  ;;  %998 = vmatprep.mubr.msk.bf16.mxu1 %vm1171_vm0, %v1170_v0  ;;  %1086 = vtanh.f32 %v325_v29 }
 0x16a   :  { %1088 = vtanh.f32 %v328_v32  ;;  %v1083_v34 = vpop.eup %1082 }
 0x16c   :  { %v1085_v35 = vpop.eup %1084 }
 0x16d   :  { %v332_v36 = vpop.f32.mrb[72].mxu0  ;;  %v393_v37 = vpack.c.bf16 %v1085_v35, %v1083_v34 }
 0x16e   :  { %v333_v38 = vadd.f32 %v1397_v1, %v332_v36  ;;  %v924_v39 = vpop.f32.mrb[73].mxu0 }
 0x16f   :  { %v335_v40 = vpop.f32.mrb[74].mxu0  ;;  %999 = vmatmul.mubr.msk.bf16.gmra.mrb[64].mxu1 %vm433_vm2, %v393_v37 }
 0x170   :  { %v336_v41 = vadd.f32 %v1397_v1, %v335_v40  ;;  %v925_v42 = vpop.f32.mrb[75].mxu0  ;;  %1002 = vmatprep.mubr.msk.bf16.mxu1 %vm1171_vm0, %v1170_v0  ;;  %1090 = vtanh.f32 %v333_v38  ;;  %v1495_v1 = vld [vmem:[%s1690_s3 + $0x1] ss:$0 sm:$0xff] }
 0x172   :  { %1092 = vtanh.f32 %v336_v41  ;;  %v1087_v43 = vpop.eup %1086 }
 0x174   :  { %v1089_v44 = vpop.eup %1088 }
 0x175   :  { %v394_v45 = vpack.c.bf16 %v1089_v44, %v1087_v43 }
 0x177   :  { %1003 = vmatmul.mubr.msk.bf16.gmra.mrb[68].mxu1 %vm433_vm2, %v394_v45 }
 0x178   :  { %1006 = vmatprep.mubr.msk.bf16.mxu1 %vm1171_vm0, %v1170_v0 }
 0x17a   :  { %v1091_v46 = vpop.eup %1090 }
 0x17c   :  { %v1093_v47 = vpop.eup %1092 }
 0x17d   :  { %v395_v48 = vpack.c.bf16 %v1093_v47, %v1091_v46 }
 0x17f   :  { %1007 = vmatmul.mubr.msk.bf16.gmra.mrb[72].mxu1 %vm433_vm2, %v395_v48 }
 0x1c2   :  { %v525_v49 = vpop.f32.mrb[0].mxu1 }
 0x1c3   :  { %v526_v50 = vadd.f32 %v1495_v1, %v525_v49  ;;  %v936_v51 = vpop.f32.mrb[1].mxu1 }
 0x1c4   :  { %v528_v52 = vpop.f32.mrb[2].mxu1 }
 0x1c5   :  { %1094 = vtanh.f32 %v526_v50  ;;  %v529_v53 = vadd.f32 %v1495_v1, %v528_v52  ;;  %v937_v54 = vpop.f32.mrb[3].mxu1 }
 0x1c7   :  { %1096 = vtanh.f32 %v529_v53 }
 0x1ca   :  { %v533_v0 = vpop.f32.mrb[4].mxu1 }
 0x1cb   :  { %v534_v55 = vadd.f32 %v1495_v1, %v533_v0  ;;  %v940_v56 = vpop.f32.mrb[5].mxu1 }
 0x1cc   :  { %v536_v57 = vpop.f32.mrb[6].mxu1 }
 0x1cd   :  { %1098 = vtanh.f32 %v534_v55  ;;  %v537_v58 = vadd.f32 %v1495_v1, %v536_v57  ;;  %v941_v59 = vpop.f32.mrb[7].mxu1 }
 0x1cf   :  { %v1095_v60 = vpop.eup %1094  ;;  %1100 = vtanh.f32 %v537_v58 }
 0x1d0   :  { %714 = vst.msk [vmem:[%s1691_s4] sm:$0xff] %vm433_vm2, %v1095_v60 }
 0x1d1   :  { %v1097_v61 = vpop.eup %1096 }
 0x1d2   :  { %715 = vst.msk [vmem:[%s1691_s4 + $0x8] sm:$0xff] %vm433_vm2, %v1097_v61  ;;  %v541_v62 = vpop.f32.mrb[8].mxu1 }
 0x1d3   :  { %v542_v63 = vadd.f32 %v1495_v1, %v541_v62  ;;  %v944_v2 = vpop.f32.mrb[9].mxu1 }
 0x1d4   :  { %v544_v3 = vpop.f32.mrb[10].mxu1 }
 0x1d5   :  { %1102 = vtanh.f32 %v542_v63  ;;  %v545_v4 = vadd.f32 %v1495_v1, %v544_v3  ;;  %v945_v5 = vpop.f32.mrb[11].mxu1 }
 0x1d7   :  { %v1099_v6 = vpop.eup %1098  ;;  %1104 = vtanh.f32 %v545_v4 }
 0x1d8   :  { %716 = vst.msk [vmem:[%s1691_s4 + $0x10] sm:$0xff] %vm433_vm2, %v1099_v6 }
 0x1d9   :  { %v1101_v7 = vpop.eup %1100 }
 0x1da   :  { %717 = vst.msk [vmem:[%s1691_s4 + $0x18] sm:$0xff] %vm433_vm2, %v1101_v7  ;;  %v549_v8 = vpop.f32.mrb[12].mxu1 }
 0x1db   :  { %v550_v9 = vadd.f32 %v1495_v1, %v549_v8  ;;  %v948_v10 = vpop.f32.mrb[13].mxu1 }
 0x1dc   :  { %v552_v11 = vpop.f32.mrb[14].mxu1 }
 0x1dd   :  { %1106 = vtanh.f32 %v550_v9  ;;  %v553_v12 = vadd.f32 %v1495_v1, %v552_v11  ;;  %v949_v13 = vpop.f32.mrb[15].mxu1 }
 0x1df   :  { %v1103_v14 = vpop.eup %1102  ;;  %1108 = vtanh.f32 %v553_v12 }
 0x1e0   :  { %718 = vst.msk [vmem:[%s1691_s4 + $0x20] sm:$0xff] %vm433_vm2, %v1103_v14 }
 0x1e1   :  { %v1105_v15 = vpop.eup %1104 }
 0x1e2   :  { %719 = vst.msk [vmem:[%s1691_s4 + $0x28] sm:$0xff] %vm433_vm2, %v1105_v15  ;;  %v557_v16 = vpop.f32.mrb[16].mxu1 }
 0x1e3   :  { %v558_v17 = vadd.f32 %v1495_v1, %v557_v16  ;;  %v952_v18 = vpop.f32.mrb[17].mxu1 }
 0x1e4   :  { %v560_v19 = vpop.f32.mrb[18].mxu1 }
 0x1e5   :  { %1110 = vtanh.f32 %v558_v17  ;;  %v561_v20 = vadd.f32 %v1495_v1, %v560_v19  ;;  %v953_v21 = vpop.f32.mrb[19].mxu1 }
 0x1e7   :  { %v1107_v22 = vpop.eup %1106  ;;  %1112 = vtanh.f32 %v561_v20 }
 0x1e8   :  { %720 = vst.msk [vmem:[%s1691_s4 + $0x30] sm:$0xff] %vm433_vm2, %v1107_v22 }
 0x1e9   :  { %v1109_v23 = vpop.eup %1108 }
 0x1ea   :  { %721 = vst.msk [vmem:[%s1691_s4 + $0x38] sm:$0xff] %vm433_vm2, %v1109_v23  ;;  %v565_v24 = vpop.f32.mrb[20].mxu1 }
 0x1eb   :  { %v566_v25 = vadd.f32 %v1495_v1, %v565_v24  ;;  %v956_v26 = vpop.f32.mrb[21].mxu1 }
 0x1ec   :  { %v568_v27 = vpop.f32.mrb[22].mxu1 }
 0x1ed   :  { %1114 = vtanh.f32 %v566_v25  ;;  %v569_v28 = vadd.f32 %v1495_v1, %v568_v27  ;;  %v957_v29 = vpop.f32.mrb[23].mxu1 }
 0x1ef   :  { %v1111_v30 = vpop.eup %1110  ;;  %1116 = vtanh.f32 %v569_v28 }
 0x1f0   :  { %722 = vst.msk [vmem:[%s1691_s4 + $0x40] sm:$0xff] %vm433_vm2, %v1111_v30 }
 0x1f1   :  { %v1113_v31 = vpop.eup %1112 }
 0x1f2   :  { %723 = vst.msk [vmem:[%s1691_s4 + $0x48] sm:$0xff] %vm433_vm2, %v1113_v31  ;;  %v573_v32 = vpop.f32.mrb[24].mxu1 }
 0x1f3   :  { %v574_v33 = vadd.f32 %v1495_v1, %v573_v32  ;;  %v960_v34 = vpop.f32.mrb[25].mxu1 }
 0x1f4   :  { %v576_v35 = vpop.f32.mrb[26].mxu1 }
 0x1f5   :  { %1118 = vtanh.f32 %v574_v33  ;;  %v577_v36 = vadd.f32 %v1495_v1, %v576_v35  ;;  %v961_v37 = vpop.f32.mrb[27].mxu1 }
 0x1f7   :  { %v1115_v38 = vpop.eup %1114  ;;  %1120 = vtanh.f32 %v577_v36 }
 0x1f8   :  { %724 = vst.msk [vmem:[%s1691_s4 + $0x50] sm:$0xff] %vm433_vm2, %v1115_v38 }
 0x1f9   :  { %v1117_v39 = vpop.eup %1116 }
 0x1fa   :  { %725 = vst.msk [vmem:[%s1691_s4 + $0x58] sm:$0xff] %vm433_vm2, %v1117_v39  ;;  %v581_v40 = vpop.f32.mrb[28].mxu1 }
 0x1fb   :  { %v582_v41 = vadd.f32 %v1495_v1, %v581_v40  ;;  %v964_v42 = vpop.f32.mrb[29].mxu1 }
 0x1fc   :  { %v584_v43 = vpop.f32.mrb[30].mxu1 }
 0x1fd   :  { %1122 = vtanh.f32 %v582_v41  ;;  %v585_v44 = vadd.f32 %v1495_v1, %v584_v43  ;;  %v965_v45 = vpop.f32.mrb[31].mxu1 }
 0x1ff   :  { %v1119_v46 = vpop.eup %1118  ;;  %1124 = vtanh.f32 %v585_v44 }
 0x200   :  { %726 = vst.msk [vmem:[%s1691_s4 + $0x60] sm:$0xff] %vm433_vm2, %v1119_v46 }
 0x201   :  { %v1121_v47 = vpop.eup %1120 }
 0x202   :  { %727 = vst.msk [vmem:[%s1691_s4 + $0x68] sm:$0xff] %vm433_vm2, %v1121_v47  ;;  %v589_v48 = vpop.f32.mrb[32].mxu1 }
 0x203   :  { %v590_v49 = vadd.f32 %v1495_v1, %v589_v48  ;;  %v968_v50 = vpop.f32.mrb[33].mxu1 }
 0x204   :  { %v592_v51 = vpop.f32.mrb[34].mxu1 }
 0x205   :  { %1126 = vtanh.f32 %v590_v49  ;;  %v593_v52 = vadd.f32 %v1495_v1, %v592_v51  ;;  %v969_v53 = vpop.f32.mrb[35].mxu1 }
 0x207   :  { %v1123_v54 = vpop.eup %1122  ;;  %1128 = vtanh.f32 %v593_v52 }
 0x208   :  { %728 = vst.msk [vmem:[%s1691_s4 + $0x70] sm:$0xff] %vm433_vm2, %v1123_v54 }
 0x209   :  { %v1125_v0 = vpop.eup %1124 }
 0x20a   :  { %729 = vst.msk [vmem:[%s1691_s4 + $0x78] sm:$0xff] %vm433_vm2, %v1125_v0  ;;  %v597_v55 = vpop.f32.mrb[36].mxu1 }
 0x20b   :  { %v598_v56 = vadd.f32 %v1495_v1, %v597_v55  ;;  %v972_v57 = vpop.f32.mrb[37].mxu1 }
 0x20c   :  { %v600_v58 = vpop.f32.mrb[38].mxu1 }
 0x20d   :  { %1130 = vtanh.f32 %v598_v56  ;;  %v601_v59 = vadd.f32 %v1495_v1, %v600_v58  ;;  %v973_v60 = vpop.f32.mrb[39].mxu1 }
 0x20f   :  { %v1127_v61 = vpop.eup %1126  ;;  %1132 = vtanh.f32 %v601_v59 }
 0x210   :  { %730 = vst.msk [vmem:[%s1691_s4 + $0x80] sm:$0xff] %vm433_vm2, %v1127_v61 }
 0x211   :  { %v1129_v62 = vpop.eup %1128 }
 0x212   :  { %731 = vst.msk [vmem:[%s1691_s4 + $0x88] sm:$0xff] %vm433_vm2, %v1129_v62  ;;  %v605_v63 = vpop.f32.mrb[40].mxu1 }
 0x213   :  { %v606_v2 = vadd.f32 %v1495_v1, %v605_v63  ;;  %v976_v3 = vpop.f32.mrb[41].mxu1 }
 0x214   :  { %v608_v4 = vpop.f32.mrb[42].mxu1 }
 0x215   :  { %1134 = vtanh.f32 %v606_v2  ;;  %v609_v5 = vadd.f32 %v1495_v1, %v608_v4  ;;  %v977_v6 = vpop.f32.mrb[43].mxu1 }
 0x217   :  { %v1131_v7 = vpop.eup %1130  ;;  %1136 = vtanh.f32 %v609_v5 }
 0x218   :  { %732 = vst.msk [vmem:[%s1691_s4 + $0x90] sm:$0xff] %vm433_vm2, %v1131_v7 }
 0x219   :  { %v1133_v8 = vpop.eup %1132 }
 0x21a   :  { %733 = vst.msk [vmem:[%s1691_s4 + $0x98] sm:$0xff] %vm433_vm2, %v1133_v8  ;;  %v613_v9 = vpop.f32.mrb[44].mxu1 }
 0x21b   :  { %v614_v10 = vadd.f32 %v1495_v1, %v613_v9  ;;  %v980_v11 = vpop.f32.mrb[45].mxu1 }
 0x21c   :  { %v616_v12 = vpop.f32.mrb[46].mxu1 }
 0x21d   :  { %1138 = vtanh.f32 %v614_v10  ;;  %v617_v13 = vadd.f32 %v1495_v1, %v616_v12  ;;  %v981_v14 = vpop.f32.mrb[47].mxu1 }
 0x21f   :  { %v1135_v15 = vpop.eup %1134  ;;  %1140 = vtanh.f32 %v617_v13 }
 0x220   :  { %734 = vst.msk [vmem:[%s1691_s4 + $0xa0] sm:$0xff] %vm433_vm2, %v1135_v15 }
 0x221   :  { %v1137_v16 = vpop.eup %1136 }
 0x222   :  { %735 = vst.msk [vmem:[%s1691_s4 + $0xa8] sm:$0xff] %vm433_vm2, %v1137_v16  ;;  %v621_v17 = vpop.f32.mrb[48].mxu1 }
 0x223   :  { %v622_v18 = vadd.f32 %v1495_v1, %v621_v17  ;;  %v984_v19 = vpop.f32.mrb[49].mxu1 }
 0x224   :  { %v624_v20 = vpop.f32.mrb[50].mxu1 }
 0x225   :  { %1142 = vtanh.f32 %v622_v18  ;;  %v625_v21 = vadd.f32 %v1495_v1, %v624_v20  ;;  %v985_v22 = vpop.f32.mrb[51].mxu1 }
 0x227   :  { %v1139_v23 = vpop.eup %1138  ;;  %1144 = vtanh.f32 %v625_v21 }
 0x228   :  { %736 = vst.msk [vmem:[%s1691_s4 + $0xb0] sm:$0xff] %vm433_vm2, %v1139_v23 }
 0x229   :  { %v1141_v24 = vpop.eup %1140 }
 0x22a   :  { %737 = vst.msk [vmem:[%s1691_s4 + $0xb8] sm:$0xff] %vm433_vm2, %v1141_v24  ;;  %v629_v25 = vpop.f32.mrb[52].mxu1 }
 0x22b   :  { %v630_v26 = vadd.f32 %v1495_v1, %v629_v25  ;;  %v988_v27 = vpop.f32.mrb[53].mxu1 }
 0x22c   :  { %v632_v28 = vpop.f32.mrb[54].mxu1 }
 0x22d   :  { %1146 = vtanh.f32 %v630_v26  ;;  %v633_v29 = vadd.f32 %v1495_v1, %v632_v28  ;;  %v989_v30 = vpop.f32.mrb[55].mxu1 }
 0x22f   :  { %v1143_v31 = vpop.eup %1142  ;;  %1148 = vtanh.f32 %v633_v29 }
 0x230   :  { %738 = vst.msk [vmem:[%s1691_s4 + $0xc0] sm:$0xff] %vm433_vm2, %v1143_v31 }
 0x231   :  { %v1145_v32 = vpop.eup %1144 }
 0x232   :  { %739 = vst.msk [vmem:[%s1691_s4 + $0xc8] sm:$0xff] %vm433_vm2, %v1145_v32  ;;  %v637_v33 = vpop.f32.mrb[56].mxu1 }
 0x233   :  { %v638_v34 = vadd.f32 %v1495_v1, %v637_v33  ;;  %v992_v35 = vpop.f32.mrb[57].mxu1 }
 0x234   :  { %v640_v36 = vpop.f32.mrb[58].mxu1 }
 0x235   :  { %1150 = vtanh.f32 %v638_v34  ;;  %v641_v37 = vadd.f32 %v1495_v1, %v640_v36  ;;  %v993_v38 = vpop.f32.mrb[59].mxu1 }
 0x237   :  { %v1147_v39 = vpop.eup %1146  ;;  %1152 = vtanh.f32 %v641_v37 }
 0x238   :  { %740 = vst.msk [vmem:[%s1691_s4 + $0xd0] sm:$0xff] %vm433_vm2, %v1147_v39 }
 0x239   :  { %v1149_v40 = vpop.eup %1148 }
 0x23a   :  { %741 = vst.msk [vmem:[%s1691_s4 + $0xd8] sm:$0xff] %vm433_vm2, %v1149_v40  ;;  %v645_v41 = vpop.f32.mrb[60].mxu1 }
 0x23b   :  { %v646_v42 = vadd.f32 %v1495_v1, %v645_v41  ;;  %v996_v43 = vpop.f32.mrb[61].mxu1 }
 0x23c   :  { %v648_v44 = vpop.f32.mrb[62].mxu1 }
 0x23d   :  { %1154 = vtanh.f32 %v646_v42  ;;  %v649_v45 = vadd.f32 %v1495_v1, %v648_v44  ;;  %v997_v46 = vpop.f32.mrb[63].mxu1 }
 0x23f   :  { %v1151_v47 = vpop.eup %1150  ;;  %1156 = vtanh.f32 %v649_v45 }
 0x240   :  { %742 = vst.msk [vmem:[%s1691_s4 + $0xe0] sm:$0xff] %vm433_vm2, %v1151_v47 }
 0x241   :  { %v1153_v48 = vpop.eup %1152 }
 0x242   :  { %743 = vst.msk [vmem:[%s1691_s4 + $0xe8] sm:$0xff] %vm433_vm2, %v1153_v48  ;;  %v653_v49 = vpop.f32.mrb[64].mxu1 }
 0x243   :  { %v654_v50 = vadd.f32 %v1495_v1, %v653_v49  ;;  %v1000_v51 = vpop.f32.mrb[65].mxu1 }
 0x244   :  { %v656_v52 = vpop.f32.mrb[66].mxu1 }
 0x245   :  { %1158 = vtanh.f32 %v654_v50  ;;  %v657_v53 = vadd.f32 %v1495_v1, %v656_v52  ;;  %v1001_v54 = vpop.f32.mrb[67].mxu1 }
 0x247   :  { %v1155_v0 = vpop.eup %1154  ;;  %1160 = vtanh.f32 %v657_v53 }
 0x248   :  { %744 = vst.msk [vmem:[%s1691_s4 + $0xf0] sm:$0xff] %vm433_vm2, %v1155_v0 }
 0x249   :  { %v1157_v55 = vpop.eup %1156 }
 0x24a   :  { %745 = vst.msk [vmem:[%s1691_s4 + $0xf8] sm:$0xff] %vm433_vm2, %v1157_v55  ;;  %v661_v56 = vpop.f32.mrb[68].mxu1 }
 0x24b   :  { %v662_v57 = vadd.f32 %v1495_v1, %v661_v56  ;;  %v1004_v58 = vpop.f32.mrb[69].mxu1 }
 0x24c   :  { %v664_v59 = vpop.f32.mrb[70].mxu1 }
 0x24d   :  { %1162 = vtanh.f32 %v662_v57  ;;  %v665_v60 = vadd.f32 %v1495_v1, %v664_v59  ;;  %v1005_v61 = vpop.f32.mrb[71].mxu1 }
 0x24f   :  { %v1159_v62 = vpop.eup %1158  ;;  %1164 = vtanh.f32 %v665_v60 }
 0x250   :  { %746 = vst.msk [vmem:[%s1691_s4 + $0x100] sm:$0xff] %vm433_vm2, %v1159_v62 }
 0x251   :  { %v1161_v63 = vpop.eup %1160 }
 0x252   :  { %747 = vst.msk [vmem:[%s1691_s4 + $0x108] sm:$0xff] %vm433_vm2, %v1161_v63  ;;  %v669_v2 = vpop.f32.mrb[72].mxu1 }
 0x253   :  { %v670_v3 = vadd.f32 %v1495_v1, %v669_v2  ;;  %v1008_v4 = vpop.f32.mrb[73].mxu1 }
 0x254   :  { %v672_v5 = vpop.f32.mrb[74].mxu1 }
 0x255   :  { %1166 = vtanh.f32 %v670_v3  ;;  %v673_v6 = vadd.f32 %v1495_v1, %v672_v5  ;;  %v1009_v7 = vpop.f32.mrb[75].mxu1 }
 0x257   :  { %v1163_v8 = vpop.eup %1162  ;;  %1168 = vtanh.f32 %v673_v6 }
 0x258   :  { %748 = vst.msk [vmem:[%s1691_s4 + $0x110] sm:$0xff] %vm433_vm2, %v1163_v8 }
 0x259   :  { %v1165_v9 = vpop.eup %1164 }
 0x25a   :  { %749 = vst.msk [vmem:[%s1691_s4 + $0x118] sm:$0xff] %vm433_vm2, %v1165_v9 }
 0x25f   :  { %v1167_v10 = vpop.eup %1166 }
 0x260   :  { %750 = vst.msk [vmem:[%s1691_s4 + $0x120] sm:$0xff] %vm433_vm2, %v1167_v10 }
 0x261   :  { %v1169_v1 = vpop.eup %1168 }
 0x262   :  { %751 = vst.msk [vmem:[%s1691_s4 + $0x128] sm:$0xff] %vm433_vm2, %v1169_v1 }

</bundles_post_ra>
